<compile_context>
chip_gen: v6e
topology: v6e:2x2x1
jax: 0.10.0
libtpu: 0.0.40
codegen_flags: <defaults>
</compile_context>

<pallas_src>
import functools

import jax
import jax.numpy as jnp
from jax import lax
from jax.experimental import pallas as pl
from jax.experimental.pallas import tpu as pltpu


def _focal_loss_kernel(x_ref, t_ref, a_ref, o_ref, *, gamma, n_valid, size_average):
    """One batch tile.

    x_ref: (C, TILE_N) logits  — classes on sublanes, batch samples on lanes.
    t_ref: (1, TILE_N) int32   — target class per sample (-1 for padded cols).
    a_ref: (C, 1)      f32     — per-class alpha (VMEM-resident across grid).
    o_ref: (1, 1)      f32     — loss accumulator (VMEM-resident across grid).
    """
    i = pl.program_id(0)
    tile_n = x_ref.shape[1]

    @pl.when(i == 0)
    def _init():
        o_ref[...] = jnp.zeros_like(o_ref)

    x = x_ref[...].astype(jnp.float32)           # (C, TILE_N)
    tgt = t_ref[...]                             # (1, TILE_N) int32
    alpha = a_ref[...].astype(jnp.float32)       # (C, 1)

    c = x.shape[0]

    # One-hot selection of the target class along the (sublane) class axis
    # (equivalent of the PyTorch scatter_(1, ids, 1)).  Padded columns carry
    # target -1 so their mask (and hence alpha_t and the loss term) is zero.
    class_ids = lax.broadcasted_iota(jnp.int32, (c, tile_n), 0)
    mask = (class_ids == tgt).astype(jnp.float32)                  # (C, TILE_N)

    # Numerically stable log-softmax over the class axis: avoids the full-size
    # p = e / denom divide and log() of an underflowed probability.
    m = jnp.max(x, axis=0, keepdims=True)                           # (1, TILE_N)
    shifted = x - m
    log_denom = jnp.log(jnp.sum(jnp.exp(shifted), axis=0, keepdims=True))
    log_p_t = jnp.sum(shifted * mask, axis=0, keepdims=True) - log_denom   # (1, TILE_N)
    probs = jnp.exp(log_p_t)                                                # (1, TILE_N)

    # Per-sample alpha gathered via the same one-hot mask.
    alpha_t = jnp.sum(alpha * mask, axis=0, keepdims=True)          # (1, TILE_N)

    one_minus_p = 1.0 - probs
    gamma_f = float(gamma)
    if gamma_f.is_integer() and 0.0 <= gamma_f <= 8.0:
        # Integer gamma: plain VPU multiplies; avoids exp(gamma*log(1-p)) and
        # the log(0) edge case when probs == 1.
        g = int(gamma_f)
        if g == 0:
            focal = jnp.ones_like(one_minus_p)
        else:
            focal = one_minus_p
            for _ in range(g - 1):
                focal = focal * one_minus_p
    else:
        focal = jnp.power(one_minus_p, jnp.float32(gamma_f))

    per_sample = -alpha_t * focal * log_p_t                          # (1, TILE_N)

    o_ref[...] += jnp.sum(per_sample, axis=1, keepdims=True)

    @pl.when(i == pl.num_programs(0) - 1)
    def _finalize():
        if size_average:
            o_ref[...] = o_ref[...] / jnp.float32(n_valid)


def _round_up(x, m):
    return (x + m - 1) // m * m


def focal_loss(inputs, targets, alpha, *, gamma=2.0, size_average=True, tile_n=2048):
    """Pallas focal loss.

    inputs:  (N, C) float logits
    targets: (N,)   int class indices
    alpha:   (C,)   per-class scalar factors
    returns: () scalar f32 loss (mean over batch if size_average else sum)
    """
    n, c = inputs.shape

    # Lane-dense layout: batch on the 128-lane axis, classes on sublanes.
    # (Layout plumbing in the wrapper; input dtype is preserved — cast in-kernel.)
    x_t = jnp.transpose(inputs)                            # (C, N)
    t_2d = targets.reshape(1, n).astype(jnp.int32)         # (1, N)
    a_2d = jnp.asarray(alpha, jnp.float32).reshape(c, 1)   # (C, 1)

    # Cap the per-buffer tile footprint (~4 MiB) so the double-buffered
    # pipeline fits v5e's 16 MiB scoped-VMEM default and v7x's smaller VMEM.
    itemsize = jnp.dtype(x_t.dtype).itemsize
    max_tile_bytes = 4 * 1024 * 1024
    max_tile_n = max(128, (max_tile_bytes // max(c * itemsize, 1)) // 128 * 128)
    tile_n = min(int(tile_n), max_tile_n)

    n_pad = _round_up(n, 128)
    if n_pad <= tile_n:
        tile_n = n_pad
    else:
        n_pad = _round_up(n, tile_n)

    if n_pad != n:
        # Pad logits with zeros; pad targets with -1 so the one-hot mask (and
        # alpha_t) is zero for padded columns -> zero loss contribution.
        x_t = jnp.pad(x_t, ((0, 0), (0, n_pad - n)))
        t_2d = jnp.pad(t_2d, ((0, 0), (0, n_pad - n)), constant_values=-1)

    grid = (n_pad // tile_n,)

    kernel = functools.partial(
        _focal_loss_kernel,
        gamma=float(gamma),
        n_valid=n,
        size_average=bool(size_average),
    )

    out = pl.pallas_call(
        kernel,
        out_shape=jax.ShapeDtypeStruct((1, 1), jnp.float32),
        grid=grid,
        in_specs=[
            pl.BlockSpec((c, tile_n), lambda i: (0, i)),   # logits tile (pipelined)
            pl.BlockSpec((1, tile_n), lambda i: (0, i)),   # targets tile (pipelined)
            pl.BlockSpec((c, 1), lambda i: (0, 0)),        # alpha, VMEM-resident
        ],
        out_specs=pl.BlockSpec((1, 1), lambda i: (0, 0)),  # resident scalar accumulator
        compiler_params=pltpu.CompilerParams(
            dimension_semantics=("arbitrary",),
        ),
    )(x_t, t_2d, a_2d)
    return out[0, 0]


def _focal_loss_ref(inputs, targets, alpha, *, gamma=2.0, size_average=True):
    """Pure-JAX reference mirroring the PyTorch forward."""
    x = inputs.astype(jnp.float32)
    p = jax.nn.softmax(x, axis=1)
    n, c = x.shape
    mask = jax.nn.one_hot(targets, c, dtype=jnp.float32)
    probs = jnp.sum(p * mask, axis=1, keepdims=True)
    alpha_i = jnp.asarray(alpha, jnp.float32)[targets].reshape(-1, 1)
    log_p = jnp.log(probs)
    batch_loss = -alpha_i * jnp.power(1.0 - probs, gamma) * log_p
    return jnp.mean(batch_loss) if size_average else jnp.sum(batch_loss)


if __name__ == "__main__":
    class_num = 9
    batch = 8

    key = jax.random.PRNGKey(0)
    k_x, k_t, k_x2, k_t2 = jax.random.split(key, 4)

    # Module defaults: alpha = ones(class_num, 1); gamma = 2; size_average = True.
    logits = jax.random.normal(k_x, (batch, class_num), dtype=jnp.float32)
    targets = jax.random.randint(k_t, (batch,), 0, class_num, dtype=jnp.int32)
    alpha = jnp.ones((class_num,), dtype=jnp.float32)

    loss = focal_loss(logits, targets, alpha, gamma=2.0, size_average=True)
    loss = jax.block_until_ready(loss)
    ref = _focal_loss_ref(logits, targets, alpha, gamma=2.0, size_average=True)
    assert jnp.allclose(loss, ref, rtol=1e-5, atol=1e-6), (loss, ref)

    # Second (still small) shape exercising multiple grid tiles, padded last
    # tile (targets padded with -1) and the resident accumulator across the
    # grid, plus the size_average=False (sum) path.
    n2 = 300
    logits2 = jax.random.normal(k_x2, (n2, class_num), dtype=jnp.float32)
    targets2 = jax.random.randint(k_t2, (n2,), 0, class_num, dtype=jnp.int32)
    loss2 = focal_loss(logits2, targets2, alpha, gamma=2.0, size_average=True,
                       tile_n=128)
    loss2 = jax.block_until_ready(loss2)
    ref2 = _focal_loss_ref(logits2, targets2, alpha, gamma=2.0, size_average=True)
    assert jnp.allclose(loss2, ref2, rtol=1e-5, atol=1e-6), (loss2, ref2)

    loss3 = focal_loss(logits2, targets2, alpha, gamma=2.0, size_average=False,
                       tile_n=128)
    loss3 = jax.block_until_ready(loss3)
    ref3 = _focal_loss_ref(logits2, targets2, alpha, gamma=2.0, size_average=False)
    assert jnp.allclose(loss3, ref3, rtol=1e-5, atol=1e-5), (loss3, ref3)

    print("KERNEL_OK")
</pallas_src>

<mosaic_0001>
module attributes {stable_mosaic.version = 11 : i64} {
  func.func @_focal_loss_kernel(%arg0: i32, %arg1: memref<9x128xf32, #tpu.memory_space<vmem>>, %arg2: memref<1x128xi32, #tpu.memory_space<vmem>>, %arg3: memref<9x1xf32, #tpu.memory_space<vmem>>, %arg4: memref<1x1xf32, #tpu.memory_space<vmem>>) attributes {dimension_semantics = [#tpu.dimension_semantics<arbitrary>], iteration_bounds = array<i64: 1>, scalar_prefetch = 0 : i64, scratch_operands = 0 : i64, tpu.core_type = #tpu.core_type<tc>, window_params = [{transform_indices = @transform_0, window_bounds = array<i64: 9, 128>}, {transform_indices = @transform_1, window_bounds = array<i64: 1, 128>}, {pipeline_mode = #tpu.pipeline_mode<synchronous>, transform_indices = @transform_2, window_bounds = array<i64: 9, 1>}, {pipeline_mode = #tpu.pipeline_mode<synchronous>, transform_indices = @transform_3, window_bounds = array<i64: 1, 1>}]} {
    %c0_i32 = arith.constant 0 : i32
    %0 = arith.cmpi eq, %arg0, %c0_i32 : i32
    %1 = arith.extui %0 : i1 to i32
    %c0_i32_0 = arith.constant 0 : i32
    %2 = arith.cmpi ne, %1, %c0_i32_0 : i32
    scf.if %2 {
      %cst_18 = arith.constant 0.000000e+00 : f32
      %43 = vector.broadcast %cst_18 : f32 to vector<1x1xf32>
      %c0_19 = arith.constant 0 : index
      %c0_20 = arith.constant 0 : index
      %44 = vector.load %arg4[%c0_19, %c0_20] : memref<1x1xf32, #tpu.memory_space<vmem>>, vector<1x1xf32>
      tpu.vector_store %arg4[%c0_19, %c0_20], %43 {strides = array<i32>} : memref<1x1xf32, #tpu.memory_space<vmem>>, vector<1x1xf32>,
    } else {
    }
    %c0 = arith.constant 0 : index
    %c0_1 = arith.constant 0 : index
    %3 = vector.load %arg1[%c0, %c0_1] : memref<9x128xf32, #tpu.memory_space<vmem>>, vector<9x128xf32>
    %c0_2 = arith.constant 0 : index
    %c0_3 = arith.constant 0 : index
    %4 = vector.load %arg2[%c0_2, %c0_3] : memref<1x128xi32, #tpu.memory_space<vmem>>, vector<1x128xi32>
    %c0_4 = arith.constant 0 : index
    %c0_5 = arith.constant 0 : index
    %5 = vector.load %arg3[%c0_4, %c0_5] : memref<9x1xf32, #tpu.memory_space<vmem>>, vector<9x1xf32>
    %6 = tpu.iota {dimensions = array<i32: 0>} : vector<9x128xi32>
    %7 = vector.broadcast %4 : vector<1x128xi32> to vector<9x128xi32>
    %8 = arith.cmpi eq, %6, %7 : vector<9x128xi32>
    %9 = arith.extui %8 : vector<9x128xi1> to vector<9x128xi32>
    %10 = arith.sitofp %9 : vector<9x128xi32> to vector<9x128xf32>
    %cst = arith.constant dense<0xFF800000> : vector<128xf32>
    %11 = vector.multi_reduction <maximumf>, %3, %cst [0] : vector<9x128xf32> to vector<128xf32>
    %12 = vector.shape_cast %11 : vector<128xf32> to vector<1x128xf32>
    %13 = vector.broadcast %12 : vector<1x128xf32> to vector<9x128xf32>
    %14 = arith.subf %3, %13 : vector<9x128xf32>
    %15 = math.exp %14 : vector<9x128xf32>
    %cst_6 = arith.constant dense<0.000000e+00> : vector<128xf32>
    %16 = vector.multi_reduction <add>, %15, %cst_6 [0] : vector<9x128xf32> to vector<128xf32>
    %17 = vector.shape_cast %16 : vector<128xf32> to vector<1x128xf32>
    %18 = math.log %17 : vector<1x128xf32>
    %19 = arith.mulf %14, %10 : vector<9x128xf32>
    %cst_7 = arith.constant dense<0.000000e+00> : vector<128xf32>
    %20 = vector.multi_reduction <add>, %19, %cst_7 [0] : vector<9x128xf32> to vector<128xf32>
    %21 = vector.shape_cast %20 : vector<128xf32> to vector<1x128xf32>
    %22 = arith.subf %21, %18 : vector<1x128xf32>
    %23 = math.exp %22 : vector<1x128xf32>
    %24 = vector.broadcast %5 : vector<9x1xf32> to vector<9x128xf32>
    %25 = arith.mulf %24, %10 : vector<9x128xf32>
    %cst_8 = arith.constant dense<0.000000e+00> : vector<128xf32>
    %26 = vector.multi_reduction <add>, %25, %cst_8 [0] : vector<9x128xf32> to vector<128xf32>
    %27 = vector.shape_cast %26 : vector<128xf32> to vector<1x128xf32>
    %cst_9 = arith.constant 1.000000e+00 : f32
    %28 = vector.broadcast %cst_9 : f32 to vector<1x128xf32>
    %29 = arith.subf %28, %23 : vector<1x128xf32>
    %30 = arith.mulf %29, %29 : vector<1x128xf32>
    %cst_10 = arith.constant 0.000000e+00 : f32
    %31 = vector.broadcast %cst_10 : f32 to vector<1x128xf32>
    %32 = arith.subf %31, %27 : vector<1x128xf32>
    %33 = arith.mulf %32, %30 : vector<1x128xf32>
    %34 = arith.mulf %33, %22 : vector<1x128xf32>
    %c0_11 = arith.constant 0 : index
    %c0_12 = arith.constant 0 : index
    %35 = vector.load %arg4[%c0_11, %c0_12] : memref<1x1xf32, #tpu.memory_space<vmem>>, vector<1x1xf32>
    %cst_13 = arith.constant dense<0.000000e+00> : vector<1xf32>
    %36 = vector.multi_reduction <add>, %34, %cst_13 [1] : vector<1x128xf32> to vector<1xf32>
    %37 = vector.shape_cast %36 : vector<1xf32> to vector<1x1xf32>
    %38 = arith.addf %35, %37 : vector<1x1xf32>
    %c0_14 = arith.constant 0 : index
    %c0_15 = arith.constant 0 : index
    %39 = vector.load %arg4[%c0_14, %c0_15] : memref<1x1xf32, #tpu.memory_space<vmem>>, vector<1x1xf32>
    tpu.vector_store %arg4[%c0_14, %c0_15], %38 {strides = array<i32>} : memref<1x1xf32, #tpu.memory_space<vmem>>, vector<1x1xf32>,
    %c0_i32_16 = arith.constant 0 : i32
    %40 = arith.cmpi eq, %arg0, %c0_i32_16 : i32
    %41 = arith.extui %40 : i1 to i32
    %c0_i32_17 = arith.constant 0 : i32
    %42 = arith.cmpi ne, %41, %c0_i32_17 : i32
    scf.if %42 {
      %c0_18 = arith.constant 0 : index
      %c0_19 = arith.constant 0 : index
      %43 = vector.load %arg4[%c0_18, %c0_19] : memref<1x1xf32, #tpu.memory_space<vmem>>, vector<1x1xf32>
      %cst_20 = arith.constant 8.000000e+00 : f32
      %44 = vector.broadcast %cst_20 : f32 to vector<1x1xf32>
      %45 = arith.divf %43, %44 : vector<1x1xf32>
      %c0_21 = arith.constant 0 : index
      %c0_22 = arith.constant 0 : index
      %46 = vector.load %arg4[%c0_21, %c0_22] : memref<1x1xf32, #tpu.memory_space<vmem>>, vector<1x1xf32>
      tpu.vector_store %arg4[%c0_21, %c0_22], %45 {strides = array<i32>} : memref<1x1xf32, #tpu.memory_space<vmem>>, vector<1x1xf32>,
    } else {
    }
    return
  }
  func.func @transform_0(%arg0: i32) -> (i32, i32) {
    %c0_i32 = arith.constant 0 : i32
    %c0_i32_0 = arith.constant 0 : i32
    return %c0_i32, %arg0 : i32, i32
  }
  func.func @transform_1(%arg0: i32) -> (i32, i32) {
    %c0_i32 = arith.constant 0 : i32
    %c0_i32_0 = arith.constant 0 : i32
    return %c0_i32, %arg0 : i32, i32
  }
  func.func @transform_2(%arg0: i32) -> (i32, i32) {
    %c0_i32 = arith.constant 0 : i32
    %c0_i32_0 = arith.constant 0 : i32
    %c0_i32_1 = arith.constant 0 : i32
    return %c0_i32, %c0_i32_0 : i32, i32
  }
  func.func @transform_3(%arg0: i32) -> (i32, i32) {
    %c0_i32 = arith.constant 0 : i32
    %c0_i32_0 = arith.constant 0 : i32
    %c0_i32_1 = arith.constant 0 : i32
    return %c0_i32, %c0_i32_0 : i32, i32
  }
}

</mosaic_0001>

<bundles_post_ra>
// kernel: tpu_custom_call.1
= control target key start
LH: loop header
LB: loop body
LE: loop exit
PB: predicated region body
PF: predicated region fallthrough
CT: control target
= control target key end

     0   :  { %vm19_vm0 = vcmask 0   ;;  %v166_v1 = vmov 0   ;;  %v167_v2 = vmov 0.0   ;;  %s214_s0 = inlined_call_operand.vmem [shape: f32[9,128], index: 0, kind: input, shape index: {}]   ;;  %s215_s1 = inlined_call_operand.vmem [shape: s32[1,128], index: 1, kind: input, shape index: {}]   ;;  %s216_s2 = inlined_call_operand.vmem [shape: f32[9,1], index: 2, kind: input, shape index: {}]   ;;  %s217_s3 = inlined_call_operand.hbm [shape: f32[1,1], index: 3, kind: output, shape index: {}]  }
   0x1   :  { %v25_v0 = vld [vmem:[%s216_s2 + $0x8] sm:$0x1]  ;;  %135 = vset.pattern.permute.xlu0 %v166_v1  ;;  %20 = vst.msk [vmem:[#allocation2] sm:$0x1] %vm19_vm0, %v167_v2 }
   0x2   :  { %84 = vperm.xlu0 %135, %v25_v0  }
   0x3   :  { %8 = vsyncpa [#allocation3], 0  ;;  %v24_v3 = vld [vmem:[%s216_s2] sm:$0xff]  ;;  %vm39_vm1 = vcmask 1040384   ;;  %v22_v4 = vld [vmem:[%s214_s0 + $0x8] sm:$0x1]  ;;  %v26_v19 = vlaneseq }
   0x4   :  { %v21_v5 = vld [vmem:[%s214_s0] sm:$0xff]  ;;  %v40_v6 = vsel %vm39_vm1, %v22_v4, -inf }
   0x5   :  { %v41_v7 = vmax.f32 %v21_v5, %v40_v6  ;;  %v27_v22 = vshrl.u32 %v26_v19, 7  ;;  %v129_v25 = vld [vmem:[%s215_s1] ss:$0 sm:$0xff]  ;;  %s168_s1 = smov [#allocation2]  }
   0x6   :  { %79 = vperm.xlu0 %135, %v24_v3   ;;  %s121_s20 = sshll.u32 %s168_s1, 4  ;;  %s122_s20 = int_to_ptr.vmem [resolvable:$true] %s121_s20 }
   0x7   :  { %v42_v8 = vrot.slane %v41_v7, 4  ;;  %v28_v24 = vadd.s32 8, %v27_v22  ;;  %vm33_vm3 = vcmp.eq.s32.totalorder %v27_v22, %v129_v25  ;;  %s144_s21 = scalar_lea.vmem %s122_s20, 16  ;;  %s148_s22 = scalar_lea.vmem %s122_s20, 32 }
   0x8   :  { %v130_v31 = vsel %vm33_vm3, 1.0, %v167_v2  ;;  %p145_p0 = scmp.ne.s32.totalorder %s122_s20, %s144_s21  ;;  %p149_p1 = scmp.lt.s32.totalorder %s122_s20, %s122_s20 }
   0x9   :  { %v43_v9 = vmax.f32 %v41_v7, %v42_v8  ;;  %vm34_vm2 = vcmp.eq.s32.totalorder %v28_v24, %v129_v25  ;;  %p150_p2 = scmp.lt.s32.totalorder %s148_s22, %s144_s21 }
   0xa   :  { %v131_v28 = vsel %vm34_vm2, 1.0, %v167_v2  ;;  %v102_v2 = vld [vmem:[#allocation2] sm:$0x1] }
   0xb   :  { %v44_v10 = vrot.slane %v43_v9, 2  ;;  %p151_p3 = por %p150_p2, %p149_p1 }
   0xd   :  { %v45_v11 = vmax.f32 %v43_v9, %v44_v10  ;;  %p152_p4 = pnand %p151_p3, %p145_p0 }
   0xf   :  { %v46_v12 = vrot.slane %v45_v11, 1 }
  0x11   :  { %v47_v13 = vmax.f32 %v45_v11, %v46_v12 }
  0x13   :  { %v49_v14 = vsub.f32 %v22_v4, %v47_v13  ;;  %v48_v15 = vsub.f32 %v21_v5, %v47_v13 }
  0x15   :  { %v52_v16 = vmul.f32 1.442695, %v49_v14  ;;  %v50_v17 = vmul.f32 1.442695, %v48_v15  ;;  %v65_v30 = vmul.f32 %v131_v28, %v49_v14  ;;  %v64_v32 = vmul.f32 %v130_v31, %v48_v15 }
  0x17   :  { %136 = vpow2.f32 %v52_v16  ;;  %v66_v34 = vsel %vm39_vm1, %v65_v30, 0.0 }
  0x18   :  { %138 = vpow2.f32 %v50_v17  ;;  %v67_v35 = vadd.f32 %v66_v34, %v64_v32 }
  0x1a   :  { %v68_v37 = vrot.slane %v67_v35, 4 }
  0x1c   :  { %v69_v39 = vadd.f32 %v68_v37, %v67_v35 }
  0x1e   :  { %v70_v40 = vrot.slane %v69_v39, 2 }
  0x20   :  { %v71_v41 = vadd.f32 %v70_v40, %v69_v39 }
  0x22   :  { %v72_v42 = vrot.slane %v71_v41, 1 }
  0x24   :  { %v137_v18 = vpop.eup %136  ;;  %v73_v45 = vadd.f32 %v72_v42, %v71_v41 }
  0x25   :  { %v139_v20 = vpop.eup %138  ;;  %v54_v21 = vsel %vm39_vm1, %v137_v18, 0.0 }
  0x26   :  { %v55_v23 = vadd.f32 %v139_v20, %v54_v21 }
  0x28   :  { %v56_v26 = vrot.slane %v55_v23, 4 }
  0x2a   :  { %v57_v27 = vadd.f32 %v56_v26, %v55_v23 }
  0x2c   :  { %v58_v29 = vrot.slane %v57_v27, 2 }
  0x2e   :  { %v59_v33 = vadd.f32 %v58_v29, %v57_v27 }
  0x30   :  { %v60_v36 = vrot.slane %v59_v33, 1 }
  0x32   :  { %v61_v38 = vadd.f32 %v60_v36, %v59_v33 }
  0x34   :  { %140 = vlog2.f32 %v61_v38 }
  0x41   :  { %v141_v43 = vpop.eup %140 }
  0x42   :  { %v63_v44 = vmul.f32 0.6931472, %v141_v43 }
  0x44   :  { %v74_v46 = vsub.f32 %v73_v45, %v63_v44 }
  0x46   :  { %v75_v47 = vmul.f32 1.442695, %v74_v46 }
  0x48   :  { %142 = vpow2.f32 %v75_v47 }
  0x55   :  { %v143_v56 = vpop.eup %142 }
  0x56   :  { %v97_v59 = vsub.f32 1.0, %v143_v56 }
  0x58   :  { %v98_v62 = vmul.f32 %v97_v59, %v97_v59 }
  0x7d   :  { %v85_v48 = vpop.permute.xlu0 %84 }
  0x7e   :  { %v88_v49 = vmul.f32 %v131_v28, %v85_v48 }
  0x80   :  { %v89_v52 = vsel %vm39_vm1, %v88_v49, 0.0 }
  0x81   :  { %v80_v50 = vpop.permute.xlu0 %79 }
  0x82   :  { %v87_v51 = vmul.f32 %v130_v31, %v80_v50 }
  0x84   :  { %v90_v53 = vadd.f32 %v89_v52, %v87_v51 }
  0x86   :  { %v91_v54 = vrot.slane %v90_v53, 4 }
  0x88   :  { %v92_v55 = vadd.f32 %v91_v54, %v90_v53 }
  0x8a   :  { %v93_v57 = vrot.slane %v92_v55, 2 }
  0x8c   :  { %v94_v58 = vadd.f32 %v93_v57, %v92_v55 }
  0x8e   :  { %v95_v60 = vrot.slane %v94_v58, 1 }
  0x90   :  { %v96_v61 = vadd.f32 %v95_v60, %v94_v58 }
  0x92   :  { %v99_v63 = vsub.f32 0.0, %v96_v61 }
  0x94   :  { %v100_v0 = vmul.f32 %v99_v63, %v98_v62 }
  0x96   :  { %v101_v1 = vmul.f32 %v100_v0, %v74_v46 }
  0x98   :  { %103 = vadd.xlane.f32.xlu1 %v101_v1 }
 0x121   :  { %v104_v3 = vpop.xlane.xlu1 %103 }
 0x122   :  { %v105_v4 = vadd.f32 %v104_v3, %v102_v2 }
 0x124   :  { %107 = vst.msk [vmem:[#allocation2] sm:$0x1] %vm19_vm0, %v105_v4 }
 0x12b   :  { %v111_v5 = vld [vmem:[#allocation2] sm:$0x1] }
 0x12c   :  { %v113_v6 = vmul.f32 0.125, %v111_v5 }
 0x12e   :  { %114 = vst.msk [vmem:[#allocation2] sm:$0x1] %vm19_vm0, %v113_v6 }
 0x12f   :  { %155 = shalt.err (!%p152_p4)
}
 0x130   :  { %124 = dma.vmem_to_hbm [thread:$0]  %s122_s20, 16, %s217_s3, [#allocation3]  }
 0x131   :  { %164 = dma.done.wait [#allocation3], 16  }
 0x132   :  { %165 = vsyncadd [#allocation3], 4294967280 }
 0x133   :  { %128 = vsyncpa [#allocation3], 1 }

</bundles_post_ra>
